<compile_context>
chip_gen: v5e
topology: v5e:2x2
jax: 0.10.0
libtpu: 0.0.40
codegen_flags: <defaults>
</compile_context>

<pallas_src>
import functools

import jax
import jax.numpy as jnp
from jax.experimental import pallas as pl
from jax.experimental.pallas import tpu as pltpu

_LANE = 128      # lane granule (last block dim)
_SUBLANE = 8     # f32 sublane granule (second-to-last block dim)


# --------------------------------------------------------------------------
# Tile helpers
# --------------------------------------------------------------------------
def _pick_tile(dim, preferred, granule):
    """Largest t <= preferred with t % granule == 0 and dim % t == 0, else dim.

    Returning the full dim is always a legal block shape on TPU."""
    if dim <= preferred:
        return dim
    t = (preferred // granule) * granule
    while t >= granule:
        if dim % t == 0:
            return t
        t -= granule
    return dim


def _common_k_tile(nf_t, nf_f, max_tk):
    """Largest multiple of 128 <= max_tk dividing both K halves (or None)."""
    t = (max_tk // _LANE) * _LANE
    while t >= _LANE:
        if nf_t % t == 0 and nf_f % t == 0:
            return t
        t -= _LANE
    return None


def _compiler_params(block_bytes, scratch_bytes, dims):
    # Inputs/outputs are double-buffered by the Pallas pipeline.
    need = 2 * sum(block_bytes) + scratch_bytes
    limit = int(min(max(2 * need, 32 * 1024 * 1024), 100 * 1024 * 1024))
    return pltpu.CompilerParams(dimension_semantics=dims,
                                vmem_limit_bytes=limit)


# --------------------------------------------------------------------------
# Kernels
# --------------------------------------------------------------------------
def _phased_matmul_kernel(xt_ref, xf_ref, w_ref, b_ref, o_ref, acc_ref, *,
                          kt_blocks):
    """One (m, n) output tile accumulated over a phased K grid axis.

    K steps [0, kt_blocks)      : time-half activations x weight rows [0, nf_t)
    K steps [kt_blocks, last]   : freq-half activations x weight rows [nf_t, nf)
    This reproduces cat(dim=-2) + Flatten(-2) + Linear without materializing
    the concatenated activations in HBM.
    """
    k = pl.program_id(2)

    @pl.when(k == 0)
    def _init():
        acc_ref[...] = jnp.zeros_like(acc_ref)

    @pl.when(k < kt_blocks)
    def _time_half():
        acc_ref[...] += jnp.dot(xt_ref[...], w_ref[...],
                                preferred_element_type=jnp.float32)

    @pl.when(k >= kt_blocks)
    def _freq_half():
        acc_ref[...] += jnp.dot(xf_ref[...], w_ref[...],
                                preferred_element_type=jnp.float32)

    @pl.when(k == pl.num_programs(2) - 1)
    def _finalize():
        o_ref[...] = (acc_ref[...] + b_ref[...]).astype(o_ref.dtype)


def _concat_matmul_kernel(x_ref, w_ref, b_ref, o_ref, acc_ref):
    """Standard tiled matmul (fallback path: activations pre-concatenated)."""
    k = pl.program_id(2)

    @pl.when(k == 0)
    def _init():
        acc_ref[...] = jnp.zeros_like(acc_ref)

    acc_ref[...] += jnp.dot(x_ref[...], w_ref[...],
                            preferred_element_type=jnp.float32)

    @pl.when(k == pl.num_programs(2) - 1)
    def _finalize():
        o_ref[...] = (acc_ref[...] + b_ref[...]).astype(o_ref.dtype)


def _individual_fallback_kernel(x_ref, w_ref, b_ref, o_ref):
    # x_ref: [1, B, nf], w_ref: [1, nf, tw], b_ref: [1, 1, tw], o_ref: [1, B, tw]
    o_ref[0] = (jnp.dot(x_ref[0], w_ref[0], preferred_element_type=jnp.float32)
                + b_ref[0]).astype(o_ref.dtype)


# --------------------------------------------------------------------------
# Shared head (individual=False)
# --------------------------------------------------------------------------
def _shared_head(x_time, x_frequency, weight, bias, tm, tn, tk):
    B, V, D_t, P = x_time.shape
    D_f = x_frequency.shape[2]
    nf_t, nf_f = D_t * P, D_f * P
    nf, tw = weight.shape
    M = B * V
    eb = jnp.dtype(x_time.dtype).itemsize

    tm_ = _pick_tile(M, tm, _SUBLANE)
    tn_ = _pick_tile(tw, tn, _LANE)
    tk_ = _common_k_tile(nf_t, nf_f, tk)
    bias2 = bias.reshape(1, tw)

    if tk_ is not None:
        # Fast path: no HBM concat, phased K grid.
        xt = x_time.reshape(M, nf_t)            # free reshapes (trailing dims)
        xf = x_frequency.reshape(M, nf_f)
        kt, kf = nf_t // tk_, nf_f // tk_
        grid = (M // tm_, tw // tn_, kt + kf)

        blk_bytes = [tm_ * tk_ * eb, tm_ * tk_ * eb, tk_ * tn_ * eb,
                     tn_ * eb, tm_ * tn_ * eb]
        params = _compiler_params(blk_bytes, tm_ * tn_ * 4,
                                  ("parallel", "parallel", "arbitrary"))

        out = pl.pallas_call(
            functools.partial(_phased_matmul_kernel, kt_blocks=kt),
            out_shape=jax.ShapeDtypeStruct((M, tw), x_time.dtype),
            grid=grid,
            in_specs=[
                # clamped indices -> the unused half's block is not re-fetched
                pl.BlockSpec((tm_, tk_),
                             lambda i, j, k: (i, jnp.minimum(k, kt - 1))),
                pl.BlockSpec((tm_, tk_),
                             lambda i, j, k: (i, jnp.maximum(k - kt, 0))),
                pl.BlockSpec((tk_, tn_), lambda i, j, k: (k, j)),
                pl.BlockSpec((1, tn_), lambda i, j, k: (0, j)),
            ],
            out_specs=pl.BlockSpec((tm_, tn_), lambda i, j, k: (i, j)),
            scratch_shapes=[pltpu.VMEM((tm_, tn_), jnp.float32)],
            compiler_params=params,
        )(xt, xf, weight, bias2)
        return out.reshape(B, V, tw)

    # Fallback: no common 128-multiple K tile — concat in JAX, tiled matmul
    # (full-dim K block if nf itself is not 128-aligned; always legal).
    x = jnp.concatenate([x_time, x_frequency], axis=-2).reshape(M, nf)
    tkc = _pick_tile(nf, tk, _LANE)
    grid = (M // tm_, tw // tn_, nf // tkc)
    blk_bytes = [tm_ * tkc * eb, tkc * tn_ * eb, tn_ * eb, tm_ * tn_ * eb]
    params = _compiler_params(blk_bytes, tm_ * tn_ * 4,
                              ("parallel", "parallel", "arbitrary"))
    out = pl.pallas_call(
        _concat_matmul_kernel,
        out_shape=jax.ShapeDtypeStruct((M, tw), x_time.dtype),
        grid=grid,
        in_specs=[
            pl.BlockSpec((tm_, tkc), lambda i, j, k: (i, k)),
            pl.BlockSpec((tkc, tn_), lambda i, j, k: (k, j)),
            pl.BlockSpec((1, tn_), lambda i, j, k: (0, j)),
        ],
        out_specs=pl.BlockSpec((tm_, tn_), lambda i, j, k: (i, j)),
        scratch_shapes=[pltpu.VMEM((tm_, tn_), jnp.float32)],
        compiler_params=params,
    )(x, weight, bias2)
    return out.reshape(B, V, tw)


# --------------------------------------------------------------------------
# Individual head (individual=True)
# --------------------------------------------------------------------------
def _individual_head(x_time, x_frequency, weight, bias, tm, tn, tk):
    B, V, D_t, P = x_time.shape
    D_f = x_frequency.shape[2]
    nf_t, nf_f = D_t * P, D_f * P
    nf, tw = weight.shape[1], weight.shape[2]
    eb = jnp.dtype(x_time.dtype).itemsize

    tn_ = _pick_tile(tw, tn, _LANE)
    tk_ = _common_k_tile(nf_t, nf_f, tk)
    bias3 = bias.reshape(V, 1, tw)

    lane_ok = (tn_ % _LANE == 0) or V == 1
    if tk_ is not None and lane_ok:
        # Fast path: grid over (variable, out tile, phased K).  No transpose,
        # no concat: the variable axis is folded into the column index of the
        # (B, V*nf) / (B, V*tw) views, so block last-two dims stay aligned
        # and the per-variable gather/scatter is done by the index_maps.
        xt = x_time.reshape(B, V * nf_t)        # free reshapes
        xf = x_frequency.reshape(B, V * nf_f)
        kt, kf = nf_t // tk_, nf_f // tk_
        nt = tw // tn_
        grid = (V, nt, kt + kf)

        blk_bytes = [B * tk_ * eb, B * tk_ * eb, tk_ * tn_ * eb,
                     tn_ * eb, B * tn_ * eb]
        params = _compiler_params(blk_bytes, B * tn_ * 4,
                                  ("parallel", "parallel", "arbitrary"))

        out = pl.pallas_call(
            functools.partial(_phased_matmul_kernel, kt_blocks=kt),
            out_shape=jax.ShapeDtypeStruct((B, V * tw), x_time.dtype),
            grid=grid,
            in_specs=[
                pl.BlockSpec((B, tk_),
                             lambda v, j, k: (0, v * kt + jnp.minimum(k, kt - 1))),
                pl.BlockSpec((B, tk_),
                             lambda v, j, k: (0, v * kf + jnp.maximum(k - kt, 0))),
                pl.BlockSpec((None, tk_, tn_), lambda v, j, k: (v, k, j)),
                pl.BlockSpec((None, 1, tn_), lambda v, j, k: (v, 0, j)),
            ],
            out_specs=pl.BlockSpec((B, tn_), lambda v, j, k: (0, v * nt + j)),
            scratch_shapes=[pltpu.VMEM((B, tn_), jnp.float32)],
            compiler_params=params,
        )(xt, xf, weight, bias3)
        return out.reshape(B, V, tw)

    # Fallback for shapes that can't be tile-aligned: concat + transpose +
    # one whole matmul per variable (full-dim blocks, always legal).
    x = jnp.concatenate([x_time, x_frequency], axis=-2).reshape(B, V, nf)
    xv = jnp.transpose(x, (1, 0, 2))            # [V, B, nf]
    blk_bytes = [B * nf * eb, nf * tw * eb, tw * eb, B * tw * eb]
    params = _compiler_params(blk_bytes, 0, ("parallel",))
    out = pl.pallas_call(
        _individual_fallback_kernel,
        out_shape=jax.ShapeDtypeStruct((V, B, tw), x_time.dtype),
        grid=(V,),
        in_specs=[
            pl.BlockSpec((1, B, nf), lambda v: (v, 0, 0)),
            pl.BlockSpec((1, nf, tw), lambda v: (v, 0, 0)),
            pl.BlockSpec((1, 1, tw), lambda v: (v, 0, 0)),
        ],
        out_specs=pl.BlockSpec((1, B, tw), lambda v: (v, 0, 0)),
        compiler_params=params,
    )(xv, weight, bias3)
    return jnp.transpose(out, (1, 0, 2))


# --------------------------------------------------------------------------
# Public entry point
# --------------------------------------------------------------------------
def flatten_head_forward(x_time, x_frequency, weight, bias, *, individual,
                         tm=256, tn=256, tk=512):
    """Flatten_Head.forward (dropout=identity).

    x_time:      [B, V, D_t, P],  x_frequency: [B, V, D_f, P]
    shared:      weight [nf, tw],    bias [tw]
    individual:  weight [V, nf, tw], bias [V, tw]
    with nf = (D_t + D_f) * P; weight == torch Linear.weight.T.
    Returns [B, V, tw].

    Default tiles (tm=tn=256, tk=512, f32 working set < 4 MiB double-buffered)
    fit v7x's 64 MiB VMEM while presenting 256-wide tiles to the v6e/v7x MXU;
    on v5e they simply over-feed the 128-wide MXU, which is harmless.
    """
    # TODO(synk): Dropout with head_dropout > 0 in training mode is omitted
    # (identity at p=0 / eval, matching the reference forward).
    if individual:
        return _individual_head(x_time, x_frequency, weight, bias, tm, tn, tk)
    return _shared_head(x_time, x_frequency, weight, bias, tm, tn, tk)


# --------------------------------------------------------------------------
if __name__ == "__main__":
    # Primary (aligned) shapes: B=2, n_vars=4, d_model 16+16, patch_num 8
    #   -> nf = 256, target_window = 128  (exercises the phased fast paths).
    B, V, D_t, D_f, P = 2, 4, 16, 16, 8
    nf = (D_t + D_f) * P
    tw = 128

    key = jax.random.PRNGKey(0)
    k_xt, k_xf, k_w, k_b, k_wi, k_bi = jax.random.split(key, 6)

    x_time = jax.random.normal(k_xt, (B, V, D_t, P), dtype=jnp.float32)
    x_freq = jax.random.normal(k_xf, (B, V, D_f, P), dtype=jnp.float32)

    bound = 1.0 / jnp.sqrt(jnp.float32(nf))
    w_shared = jax.random.uniform(k_w, (nf, tw), jnp.float32, -bound, bound)
    b_shared = jax.random.uniform(k_b, (tw,), jnp.float32, -bound, bound)
    w_indiv = jax.random.uniform(k_wi, (V, nf, tw), jnp.float32, -bound, bound)
    b_indiv = jax.random.uniform(k_bi, (V, tw), jnp.float32, -bound, bound)

    out_shared = jax.block_until_ready(
        flatten_head_forward(x_time, x_freq, w_shared, b_shared, individual=False))
    out_indiv = jax.block_until_ready(
        flatten_head_forward(x_time, x_freq, w_indiv, b_indiv, individual=True))

    hp = jax.lax.Precision.HIGHEST
    x_flat = jnp.concatenate([x_time, x_freq], axis=-2).reshape(B, V, nf)
    ref_shared = jnp.matmul(x_flat, w_shared, precision=hp) + b_shared
    ref_indiv = jnp.einsum("bvf,vft->bvt", x_flat, w_indiv,
                           precision=hp) + b_indiv[None]

    assert out_shared.shape == (B, V, tw) and out_indiv.shape == (B, V, tw)
    assert jnp.allclose(out_shared, ref_shared, atol=1e-4, rtol=1e-4)
    assert jnp.allclose(out_indiv, ref_indiv, atol=1e-4, rtol=1e-4)

    # Misaligned shapes exercise the shape-robust fallback paths.
    B2, V2, D2t, D2f, P2, tw2 = 2, 3, 8, 8, 3, 96
    nf2 = (D2t + D2f) * P2
    k1, k2, k3, k4, k5, k6 = jax.random.split(jax.random.PRNGKey(1), 6)
    xt2 = jax.random.normal(k1, (B2, V2, D2t, P2), dtype=jnp.float32)
    xf2 = jax.random.normal(k2, (B2, V2, D2f, P2), dtype=jnp.float32)
    ws2 = jax.random.normal(k3, (nf2, tw2), dtype=jnp.float32) * 0.05
    bs2 = jax.random.normal(k4, (tw2,), dtype=jnp.float32) * 0.05
    wi2 = jax.random.normal(k5, (V2, nf2, tw2), dtype=jnp.float32) * 0.05
    bi2 = jax.random.normal(k6, (V2, tw2), dtype=jnp.float32) * 0.05

    o_s2 = jax.block_until_ready(
        flatten_head_forward(xt2, xf2, ws2, bs2, individual=False))
    o_i2 = jax.block_until_ready(
        flatten_head_forward(xt2, xf2, wi2, bi2, individual=True))
    xflat2 = jnp.concatenate([xt2, xf2], axis=-2).reshape(B2, V2, nf2)
    assert jnp.allclose(o_s2, jnp.matmul(xflat2, ws2, precision=hp) + bs2,
                        atol=1e-4, rtol=1e-4)
    assert jnp.allclose(o_i2, jnp.einsum("bvf,vft->bvt", xflat2, wi2,
                                         precision=hp) + bi2[None],
                        atol=1e-4, rtol=1e-4)

    print("KERNEL_OK")
</pallas_src>

<mosaic_0001>
module attributes {stable_mosaic.version = 11 : i64} {
  func.func @_phased_matmul_kernel(%arg0: i32, %arg1: i32, %arg2: i32, %arg3: memref<8x128xf32, #tpu.memory_space<vmem>>, %arg4: memref<8x128xf32, #tpu.memory_space<vmem>>, %arg5: memref<128x128xf32, #tpu.memory_space<vmem>>, %arg6: memref<1x128xf32, #tpu.memory_space<vmem>>, %arg7: memref<8x128xf32, #tpu.memory_space<vmem>>, %arg8: memref<8x128xf32, #tpu.memory_space<vmem>>) attributes {dimension_semantics = [#tpu.dimension_semantics<parallel>, #tpu.dimension_semantics<parallel>, #tpu.dimension_semantics<arbitrary>], iteration_bounds = array<i64: 1, 1, 2>, scalar_prefetch = 0 : i64, scratch_operands = 1 : i64, tpu.core_type = #tpu.core_type<tc>, window_params = [{transform_indices = @transform_0, window_bounds = array<i64: 8, 128>}, {transform_indices = @transform_1, window_bounds = array<i64: 8, 128>}, {transform_indices = @transform_2, window_bounds = array<i64: 128, 128>}, {transform_indices = @transform_3, window_bounds = array<i64: 1, 128>}, {transform_indices = @transform_4, window_bounds = array<i64: 8, 128>}]} {
    %c0_i32 = arith.constant 0 : i32
    %0 = arith.cmpi eq, %arg2, %c0_i32 : i32
    %1 = arith.extui %0 : i1 to i32
    %c0_i32_0 = arith.constant 0 : i32
    %2 = arith.cmpi ne, %1, %c0_i32_0 : i32
    scf.if %2 {
      %cst = arith.constant 0.000000e+00 : f32
      %12 = vector.broadcast %cst : f32 to vector<8x128xf32>
      %c0 = arith.constant 0 : index
      %c0_6 = arith.constant 0 : index
      %13 = vector.load %arg8[%c0, %c0_6] : memref<8x128xf32, #tpu.memory_space<vmem>>, vector<8x128xf32>
      tpu.vector_store %arg8[%c0, %c0_6], %12 {strides = array<i32>} : memref<8x128xf32, #tpu.memory_space<vmem>>, vector<8x128xf32>,
    } else {
    }
    %c1_i32 = arith.constant 1 : i32
    %3 = arith.cmpi slt, %arg2, %c1_i32 : i32
    %4 = arith.extui %3 : i1 to i32
    %c0_i32_1 = arith.constant 0 : i32
    %5 = arith.cmpi ne, %4, %c0_i32_1 : i32
    scf.if %5 {
      %c0 = arith.constant 0 : index
      %c0_6 = arith.constant 0 : index
      %12 = vector.load %arg8[%c0, %c0_6] : memref<8x128xf32, #tpu.memory_space<vmem>>, vector<8x128xf32>
      %c0_7 = arith.constant 0 : index
      %c0_8 = arith.constant 0 : index
      %13 = vector.load %arg3[%c0_7, %c0_8] : memref<8x128xf32, #tpu.memory_space<vmem>>, vector<8x128xf32>
      %c0_9 = arith.constant 0 : index
      %c0_10 = arith.constant 0 : index
      %14 = vector.load %arg5[%c0_9, %c0_10] : memref<128x128xf32, #tpu.memory_space<vmem>>, vector<128x128xf32>
      %cst = arith.constant dense<0.000000e+00> : vector<8x128xf32>
      %15 = tpu.matmul %13, %14, %cst {dimension_numbers = #tpu.dot_dimension_numbers<[1], [0], [0], [1], [0, 0, 1, 1], [], []>} : vector<8x128xf32>, vector<128x128xf32>, vector<8x128xf32> -> vector<8x128xf32>
      %16 = arith.addf %12, %15 : vector<8x128xf32>
      %c0_11 = arith.constant 0 : index
      %c0_12 = arith.constant 0 : index
      %17 = vector.load %arg8[%c0_11, %c0_12] : memref<8x128xf32, #tpu.memory_space<vmem>>, vector<8x128xf32>
      tpu.vector_store %arg8[%c0_11, %c0_12], %16 {strides = array<i32>} : memref<8x128xf32, #tpu.memory_space<vmem>>, vector<8x128xf32>,
    } else {
    }
    %c1_i32_2 = arith.constant 1 : i32
    %6 = arith.cmpi sge, %arg2, %c1_i32_2 : i32
    %7 = arith.extui %6 : i1 to i32
    %c0_i32_3 = arith.constant 0 : i32
    %8 = arith.cmpi ne, %7, %c0_i32_3 : i32
    scf.if %8 {
      %c0 = arith.constant 0 : index
      %c0_6 = arith.constant 0 : index
      %12 = vector.load %arg8[%c0, %c0_6] : memref<8x128xf32, #tpu.memory_space<vmem>>, vector<8x128xf32>
      %c0_7 = arith.constant 0 : index
      %c0_8 = arith.constant 0 : index
      %13 = vector.load %arg4[%c0_7, %c0_8] : memref<8x128xf32, #tpu.memory_space<vmem>>, vector<8x128xf32>
      %c0_9 = arith.constant 0 : index
      %c0_10 = arith.constant 0 : index
      %14 = vector.load %arg5[%c0_9, %c0_10] : memref<128x128xf32, #tpu.memory_space<vmem>>, vector<128x128xf32>
      %cst = arith.constant dense<0.000000e+00> : vector<8x128xf32>
      %15 = tpu.matmul %13, %14, %cst {dimension_numbers = #tpu.dot_dimension_numbers<[1], [0], [0], [1], [0, 0, 1, 1], [], []>} : vector<8x128xf32>, vector<128x128xf32>, vector<8x128xf32> -> vector<8x128xf32>
      %16 = arith.addf %12, %15 : vector<8x128xf32>
      %c0_11 = arith.constant 0 : index
      %c0_12 = arith.constant 0 : index
      %17 = vector.load %arg8[%c0_11, %c0_12] : memref<8x128xf32, #tpu.memory_space<vmem>>, vector<8x128xf32>
      tpu.vector_store %arg8[%c0_11, %c0_12], %16 {strides = array<i32>} : memref<8x128xf32, #tpu.memory_space<vmem>>, vector<8x128xf32>,
    } else {
    }
    %c1_i32_4 = arith.constant 1 : i32
    %9 = arith.cmpi eq, %arg2, %c1_i32_4 : i32
    %10 = arith.extui %9 : i1 to i32
    %c0_i32_5 = arith.constant 0 : i32
    %11 = arith.cmpi ne, %10, %c0_i32_5 : i32
    scf.if %11 {
      %c0 = arith.constant 0 : index
      %c0_6 = arith.constant 0 : index
      %12 = vector.load %arg8[%c0, %c0_6] : memref<8x128xf32, #tpu.memory_space<vmem>>, vector<8x128xf32>
      %c0_7 = arith.constant 0 : index
      %c0_8 = arith.constant 0 : index
      %13 = vector.load %arg6[%c0_7, %c0_8] : memref<1x128xf32, #tpu.memory_space<vmem>>, vector<1x128xf32>
      %14 = vector.broadcast %13 : vector<1x128xf32> to vector<8x128xf32>
      %15 = arith.addf %12, %14 : vector<8x128xf32>
      %c0_9 = arith.constant 0 : index
      %c0_10 = arith.constant 0 : index
      %16 = vector.load %arg7[%c0_9, %c0_10] : memref<8x128xf32, #tpu.memory_space<vmem>>, vector<8x128xf32>
      tpu.vector_store %arg7[%c0_9, %c0_10], %15 {strides = array<i32>} : memref<8x128xf32, #tpu.memory_space<vmem>>, vector<8x128xf32>,
    } else {
    }
    return
  }
  func.func @transform_0(%arg0: i32, %arg1: i32, %arg2: i32) -> (i32, i32) {
    %c0_i32 = arith.constant 0 : i32
    %0 = arith.minsi %arg2, %c0_i32 : i32
    %c0_i32_0 = arith.constant 0 : i32
    return %arg0, %0 : i32, i32
  }
  func.func @transform_1(%arg0: i32, %arg1: i32, %arg2: i32) -> (i32, i32) {
    %c1_i32 = arith.constant 1 : i32
    %0 = arith.subi %arg2, %c1_i32 : i32
    %c0_i32 = arith.constant 0 : i32
    %1 = arith.maxsi %0, %c0_i32 : i32
    %c0_i32_0 = arith.constant 0 : i32
    return %arg0, %1 : i32, i32
  }
  func.func @transform_2(%arg0: i32, %arg1: i32, %arg2: i32) -> (i32, i32) {
    %c0_i32 = arith.constant 0 : i32
    return %arg2, %arg1 : i32, i32
  }
  func.func @transform_3(%arg0: i32, %arg1: i32, %arg2: i32) -> (i32, i32) {
    %c0_i32 = arith.constant 0 : i32
    %c0_i32_0 = arith.constant 0 : i32
    return %c0_i32, %arg1 : i32, i32
  }
  func.func @transform_4(%arg0: i32, %arg1: i32, %arg2: i32) -> (i32, i32) {
    %c0_i32 = arith.constant 0 : i32
    return %arg0, %arg1 : i32, i32
  }
}

</mosaic_0001>

<bundles_post_ra>
// kernel: tpu_custom_call.1
= control target key start
LH: loop header
LB: loop body
LE: loop exit
PB: predicated region body
PF: predicated region fallthrough
CT: control target
= control target key end

     0   :  { %s1257_s0 = inlined_call_operand.hbm [shape: f32[8,128], index: 0, kind: input, shape index: {}]   ;;  %s1258_s1 = inlined_call_operand.hbm [shape: f32[8,128], index: 1, kind: input, shape index: {}]   ;;  %s1259_s2 = inlined_call_operand.hbm [shape: f32[256,128], index: 2, kind: input, shape index: {}]   ;;  %s1260_s3 = inlined_call_operand.vmem [shape: f32[1,128], index: 3, kind: input, shape index: {}]   ;;  %s1261_s4 = inlined_call_operand.hbm [shape: f32[8,128], index: 4, kind: output, shape index: {}]  }
   0x1   :  { %1267 = sst [smem:[#allocation19_spill]] %s1258_s1 }
   0x2   :  { %9 = vsyncpa [#allocation4], 0 }
   0x3   :  { %11 = vsyncpa [#allocation4 + $0x1], 0 }
   0x4   :  { %12 = vsyncpa [#allocation7], 0 }
   0x5   :  { %14 = vsyncpa [#allocation7 + $0x1], 0 }
   0x6   :  { %15 = vsyncpa [#allocation5], 0  ;;  %s997_s15 = smov 0   ;;  %s999_s16 = smov 0  }
   0x7   :  { %s1001_s17 = smov 0   ;;  %s1003_s18 = smov 0  }
   0x8   :  { %s1005_s19 = smov 0   ;;  %s1007_s20 = smov 0  }
   0x9   :  { %s1009_s21 = smov 0   ;;  %s1011_s22 = smov 0  }
   0xa   :  { %s1013_s23 = smov 0   ;;  %s1015_s24 = smov 0  }
   0xb LB: > { %1268 = sst [smem:[#allocation14_spill]] %s936_s17  ;;  %s1044_s25 = sadd.s32 4294967295, %s964_s24   ;;  %s964_s24 = sphi %s1015_s24, %s21_s24   ;;  %s960_s23 = sphi %s1013_s23, %s1287_s23   ;;  %s956_s22 = sphi %s1011_s22, %s1286_s22   ;;  %s952_s21 = sphi %s1009_s21, %s1247_s21   ;;  %s948_s20 = sphi %s1007_s20, %s1291_s20   ;;  %s944_s19 = sphi %s1005_s19, %s1242_s19   ;;  %s940_s18 = sphi %s1003_s18, %s1290_s18   ;;  %s936_s17 = sphi %s1001_s17, %s1285_s17   ;;  %s932_s16 = sphi %s999_s16, %s1289_s16   ;;  %s928_s15 = sphi %s997_s15, %s1288_s15  }
   0xc   : > { %1269 = sst [smem:[#allocation15_spill]] %s960_s23  ;;  %s33_s26 = sadd.s32 1, %s960_s23 }
   0xd   : > { %1270 = sst [smem:[#allocation16_spill]] %s964_s24  ;;  %p34_p0 = scmp.ge.s32.totalorder %s33_s26, 2 }
   0xe   : > { %p61_p1 = scmp.eq.s32.totalorder %s964_s24, 0  ;;  %p1262_p2 = scmp.eq.s32.totalorder %s1044_s25, 0 }
   0xf   : > { %s1293_s26 = smov (%p34_p0, %s33_s26), 0  ;;  %p924_p3 = scmp.ne.s32.totalorder %s944_s19, 0 }
  0x10   : > { %1271 = sst [smem:[#allocation17_spill]] %s1293_s26  ;;  %p100_p5 = scmp.ne.s32.totalorder %s944_s19, %s940_s18 }
  0x11   : > { %p1054_p4 = por %p924_p3, %p61_p1  ;;  %s110_s28 = ssub.s32 %s960_s23, %s1293_s26 }
  0x12   : > { %p1063_p6 = por %p100_p5, %p1262_p2  ;;  %p113_p7 = scmp.eq.s32.totalorder %s110_s28, 0 }
  0x13   : > { %s115_s30 = sadd.s32 1, %s936_s17  ;;  %p122_p8 = scmp.ne.s32.totalorder %s936_s17, %s932_s16 }
  0x14   : > { %s1071_s5 = scalar_select %p113_p7, %s936_s17, %s115_s30  }
  0x15   : > { %p124_p9 = por %p122_p8, %p61_p1  ;;  %p128_p10 = scmp.ne.s32.totalorder %s932_s16, %s928_s15 }
  0x16   : > { %1274 = sst [smem:[#allocation18_spill]] %s1071_s5  ;;  %p638_p11 = scmp.lt.s32.totalorder %s964_s24, 2 }
  0x17   : > { %p1079_p12 = por %p128_p10, %p1262_p2  ;;  %s234_s7 = sand.u32 1, %s964_s24  }
  0x18   : > { %s1276_s1 = sld [smem:[#allocation19_spill]]  ;;  %s966_s11 = smov [#allocation6]  }
  0x19   : > { %s250_s12 = sshll.u32 %s966_s11, 4  ;;  %p1091_p13 = pnand %p638_p11, %p1054_p4  ;;  %s251_s12 = int_to_ptr.vmem [resolvable:$true] %s250_s12 }
  0x1a   : > { %p1097_p0 = pnand %p638_p11, %p124_p9  ;;  %p605_p3 = scmp.ge.s32.totalorder %s964_s24, 1 }
  0x1b   : > { %p278_p5 = scmp.lt.s32.totalorder %s964_s24, 3  ;;  %s1103_s15 = scalar_lea.sflag [#allocation7], %s234_s7 }
  0x1c   : > { %p746_p8 = pneg %p1091_p13 }
  0x1e   : > { %s248_s10 = sshll.u32 %s1276_s1, 4  ;;  %s249_s10 = int_to_ptr.hbm [resolvable:$true] %s248_s10 }
  0x1f   : > { %s742_s18 = sshra.s32 %s249_s10, 4  ;;  %s743_s18 = int_to_ptr.hbm [resolvable:$true] %s742_s18 }
  0x20   : > { %s744_s28 = scalar_lea.hbm %s743_s18, 8  ;;  %p750_p2 = scmp.lt.s32.totalorder %s743_s18, %s1276_s1 }
  0x21   : > { %p745_p7 = scmp.ne.s32.totalorder %s743_s18, %s744_s28 }
  0x23   : > { %p747_p4 = pnand %p746_p8, %p745_p7 }
  0x25   : > { %p748_p10 = pneg %p747_p4 }
  0x27   : > { %p753_p9 = pnand %p750_p2, %p748_p10 }
  0x29   : > { %756 = shalt.err (!%p753_p9)
}
  0x2a   : > { %634 = dma.hbm_to_vmem [thread:$0]  (!%p1091_p13), %s249_s10, 128, %s251_s12, %s1103_s15  }
  0x2b   : > { %p1117_p7 = pnand %p605_p3, %p278_p5  ;;  %p925_p2 = scmp.ne.s32.totalorder %s952_s21, 0 }
  0x2c   : > { %p66_p8 = scmp.ne.s32.totalorder %s952_s21, %s948_s20  ;;  %p1280_p10 = scmp.eq.s32.totalorder %s1044_s25, 0 }
  0x2d   : > { %p62_p4 = por %p925_p2, %p61_p1  ;;  %s225_s13 = sshll.u32 %s1257_s0, 4  ;;  %s226_s13 = int_to_ptr.hbm [resolvable:$true] %s225_s13 }
  0x2e   : > { %p1128_p9 = por %p1280_p10, %p66_p8  ;;  %s967_s10 = smov [#allocation3]  }
  0x2f   : > { %s227_s12 = sshll.u32 %s967_s10, 4  ;;  %p1137_p13 = pnand %p638_p11, %p62_p4  ;;  %s228_s12 = int_to_ptr.vmem [resolvable:$true] %s227_s12 }
  0x30   : > { %s259_s20 = sand.u32 1, %s936_s17   ;;  %s617_s27 = sshll.u32 %s960_s23, 7 }
  0x31   : > { %s602_s28 = sshll.u32 %s259_s20, 7  ;;  %s772_s30 = sshra.s32 %s226_s13, 4  ;;  %s773_s30 = int_to_ptr.hbm [resolvable:$true] %s772_s30 }
  0x32   : > { %s774_s1 = scalar_lea.hbm %s773_s30, 8  ;;  %p776_p3 = pneg %p1137_p13 }
  0x33   : > { %p775_p1 = scmp.ne.s32.totalorder %s773_s30, %s774_s1  ;;  %s779_s10 = scalar_lea.hbm %s1257_s0, 8 }
  0x34   : > { %p781_p11 = scmp.lt.s32.totalorder %s779_s10, %s774_s1 }
  0x35   : > { %p777_p5 = pnand %p776_p3, %p775_p1 }
  0x37   : > { %p778_p2 = pneg %p777_p5 }
  0x39   : > { %p783_p8 = pnand %p781_p11, %p778_p2 }
  0x3b   : > { %786 = shalt.err (!%p783_p8)
}
  0x3c   : > { %631 = dma.hbm_to_vmem [thread:$0]  (!%p1137_p13), %s226_s13, 128, %s228_s12, [#allocation4]  }
  0x3d   : > { %s267_s30 = scalar_lea.hbm %s1259_s2, %s617_s27  ;;  %s261_s23 = scalar_lea.vmem [#allocation8], %s602_s28 }
  0x3e   : > { %s270_s5 = sshll.u32 %s261_s23, 4  ;;  %s268_s17 = sshll.u32 %s267_s30, 4  ;;  %s271_s5 = int_to_ptr.vmem [resolvable:$true] %s270_s5  ;;  %s269_s17 = int_to_ptr.hbm [resolvable:$true] %s268_s17 }
  0x3f   : > { %s968_s24 = smov 128   ;;  %s969_s9 = smov 8  }
  0x40   : > { %637 = dma.hbm_to_vmem [thread:$0]  (!%p1097_p0), %s269_s17, 2048, %s271_s5, %s1103_s15, %s968_s24, %s968_s24, %s969_s9  }
  0x41   : > { %282 = sbr.rel (%p1117_p7) target bundleno = 442 (0x1ba), region = 36  ;;  %s284_s1 = sand.u32 (!%p1117_p7), 1, %s952_s21  }
  0x42   : > { %s1159_s13 = sshll.u32 (!%p1117_p7), %s284_s1, 3  ;;  %s285_s26 = scalar_lea.sflag (!%p1117_p7), [#allocation4], %s284_s1 }
  0x43   : > { %s288_s12 = scalar_lea.vmem (!%p1117_p7), [#allocation3], %s1159_s13 }
  0x46   : > { %909 = dma.done.wait (%p1128_p9), %s285_s26, 128  }
  0x47   : > { %911 = vsyncadd (%p1128_p9), %s285_s26, 4294967168  ;;  %s294_s17 = sand.u32 1, %s1044_s25   ;;  %s296_s23 = sand.u32 1, %s944_s19  }
  0x48   : > { %s1168_s24 = sshll.u32 %s296_s23, 3  ;;  %s295_s5 = scalar_lea.sflag [#allocation7], %s294_s17 }
  0x49   : > { %s298_s14 = scalar_lea.vmem [#allocation6], %s1168_s24 }
  0x4a   : > { %913 = dma.done.wait (%p1063_p6), %s295_s5, 128  }
  0x4b   : > { %915 = vsyncadd (%p1063_p6), %s295_s5, 4294967168  ;;  %s306_s15 = sand.u32 1, %s932_s16  }
  0x4c   : > { %s608_s7 = sshll.u32 %s306_s15, 7 }
  0x4d   : > { %s1176_s8 = scalar_lea.vmem [#allocation8], %s608_s7 }
  0x4e   : > { %917 = dma.done.wait (%p1079_p12), %s295_s5, 2048  }
  0x4f   : > { %919 = vsyncadd (%p1079_p12), %s295_s5, 4294965248  ;;  %p609_p0 = scmp.ne.s32.totalorder %s956_s22, 0 }
  0x51   : > { %354 = sbr.rel (%p609_p0) target bundleno = 88 (0x58), region = 52 }
  0x56   : > { %v970_v0 = vmov 0.0  }
  0x57   : > { %355 = vst [vmem:[#allocation2] sm:$0xff] %v970_v0 }
  0x58 PF: > { %p610_p7 = scmp.ge.s32.totalorder %s956_s22, 1 }
  0x5a   : > { %359 = sbr.rel (%p610_p7) target bundleno = 256 (0x100), region = 56 }
  0x5f   : > { %v377_v1 = vld [vmem:[%s1176_s8 + $0x78] sm:$0xff]  ;;  %v376_v2 = vld [vmem:[%s1176_s8 + $0x70] sm:$0xff]  ;;  %v375_v3 = vld [vmem:[%s1176_s8 + $0x68] sm:$0xff] }
  0x60   : > { %378 = vmatpush.msra.mxu0 %v377_v1  ;;  %v374_v4 = vld [vmem:[%s1176_s8 + $0x60] sm:$0xff]  ;;  %v373_v5 = vld [vmem:[%s1176_s8 + $0x58] sm:$0xff]  ;;  %v372_v6 = vld [vmem:[%s1176_s8 + $0x50] sm:$0xff] }
  0x61   : > { %v371_v7 = vld [vmem:[%s1176_s8 + $0x48] sm:$0xff]  ;;  %v370_v8 = vld [vmem:[%s1176_s8 + $0x40] sm:$0xff]  ;;  %v369_v9 = vld [vmem:[%s1176_s8 + $0x38] sm:$0xff] }
  0x62   : > { %379 = vmatpush.msra.mxu0 %v376_v2  ;;  %v368_v10 = vld [vmem:[%s1176_s8 + $0x30] sm:$0xff]  ;;  %v367_v11 = vld [vmem:[%s1176_s8 + $0x28] sm:$0xff]  ;;  %v366_v12 = vld [vmem:[%s1176_s8 + $0x20] sm:$0xff] }
  0x63   : > { %v365_v13 = vld [vmem:[%s1176_s8 + $0x18] sm:$0xff]  ;;  %v364_v14 = vld [vmem:[%s1176_s8 + $0x10] sm:$0xff]  ;;  %v363_v15 = vld [vmem:[%s1176_s8 + $0x8] sm:$0xff] }
  0x64   : > { %380 = vmatpush.msra.mxu0 %v375_v3  ;;  %v362_v16 = vld [vmem:[%s1176_s8] sm:$0xff]  ;;  %v360_v18 = vld [vmem:[#allocation2] sm:$0xff] }
  0x65   : > { %v361_v17 = vld [vmem:[%s288_s12] sm:$0xff] }
  0x66   : > { %381 = vmatpush.msra.mxu0 %v374_v4 }
  0x68   : > { %382 = vmatpush.msra.mxu0 %v373_v5 }
  0x6a   : > { %383 = vmatpush.msra.mxu0 %v372_v6 }
  0x6c   : > { %384 = vmatpush.msra.mxu0 %v371_v7 }
  0x6e   : > { %385 = vmatpush.msra.mxu0 %v370_v8 }
  0x70   : > { %386 = vmatpush.msra.mxu0 %v369_v9 }
  0x72   : > { %387 = vmatpush.msra.mxu0 %v368_v10 }
  0x74   : > { %388 = vmatpush.msra.mxu0 %v367_v11 }
  0x76   : > { %389 = vmatpush.msra.mxu0 %v366_v12 }
  0x78   : > { %390 = vmatpush.msra.mxu0 %v365_v13 }
  0x7a   : > { %391 = vmatpush.msra.mxu0 %v364_v14 }
  0x7c   : > { %392 = vmatpush.msra.mxu0 %v363_v15 }
  0x7e   : > { %393 = vmatpush.msra.mxu0 %v362_v16 }
  0x7f   : > { %394 = vmatmul.f32.vlgmr.msra.gmra.mxu0 %v361_v17 }
  0xfc   : > { %v395_v19 = vpop.f32.mrf.mxu0 }
  0xfd   : > { %v398_v20 = vadd.f32 %v395_v19, %v360_v18 }
  0xff   : > { %399 = vst [vmem:[#allocation2] sm:$0xff] %v398_v20 }
 0x100 PF: > { %p611_p6 = scmp.lt.s32.totalorder %s956_s22, 1 }
 0x102   : > { %403 = sbr.rel (%p611_p6) target bundleno = 424 (0x1a8), region = 60 }
 0x107   : > { %v421_v21 = vld [vmem:[%s1176_s8 + $0x78] sm:$0xff]  ;;  %v420_v22 = vld [vmem:[%s1176_s8 + $0x70] sm:$0xff]  ;;  %v419_v23 = vld [vmem:[%s1176_s8 + $0x68] sm:$0xff] }
 0x108   : > { %422 = vmatpush.msra.mxu0 %v421_v21  ;;  %v418_v24 = vld [vmem:[%s1176_s8 + $0x60] sm:$0xff]  ;;  %v417_v25 = vld [vmem:[%s1176_s8 + $0x58] sm:$0xff]  ;;  %v416_v26 = vld [vmem:[%s1176_s8 + $0x50] sm:$0xff] }
 0x109   : > { %v415_v27 = vld [vmem:[%s1176_s8 + $0x48] sm:$0xff]  ;;  %v414_v28 = vld [vmem:[%s1176_s8 + $0x40] sm:$0xff]  ;;  %v413_v29 = vld [vmem:[%s1176_s8 + $0x38] sm:$0xff] }
 0x10a   : > { %423 = vmatpush.msra.mxu0 %v420_v22  ;;  %v412_v30 = vld [vmem:[%s1176_s8 + $0x30] sm:$0xff]  ;;  %v411_v31 = vld [vmem:[%s1176_s8 + $0x28] sm:$0xff]  ;;  %v410_v32 = vld [vmem:[%s1176_s8 + $0x20] sm:$0xff] }
 0x10b   : > { %v409_v33 = vld [vmem:[%s1176_s8 + $0x18] sm:$0xff]  ;;  %v408_v34 = vld [vmem:[%s1176_s8 + $0x10] sm:$0xff]  ;;  %v407_v35 = vld [vmem:[%s1176_s8 + $0x8] sm:$0xff] }
 0x10c   : > { %424 = vmatpush.msra.mxu0 %v419_v23  ;;  %v406_v36 = vld [vmem:[%s1176_s8] sm:$0xff]  ;;  %v405_v37 = vld [vmem:[%s298_s14] sm:$0xff] }
 0x10d   : > { %v404_v38 = vld [vmem:[#allocation2] sm:$0xff] }
 0x10e   : > { %425 = vmatpush.msra.mxu0 %v418_v24 }
 0x110   : > { %426 = vmatpush.msra.mxu0 %v417_v25 }
 0x112   : > { %427 = vmatpush.msra.mxu0 %v416_v26 }
 0x114   : > { %428 = vmatpush.msra.mxu0 %v415_v27 }
 0x116   : > { %429 = vmatpush.msra.mxu0 %v414_v28 }
 0x118   : > { %430 = vmatpush.msra.mxu0 %v413_v29 }
 0x11a   : > { %431 = vmatpush.msra.mxu0 %v412_v30 }
 0x11c   : > { %432 = vmatpush.msra.mxu0 %v411_v31 }
 0x11e   : > { %433 = vmatpush.msra.mxu0 %v410_v32 }
 0x120   : > { %434 = vmatpush.msra.mxu0 %v409_v33 }
 0x122   : > { %435 = vmatpush.msra.mxu0 %v408_v34 }
 0x124   : > { %436 = vmatpush.msra.mxu0 %v407_v35 }
 0x126   : > { %437 = vmatpush.msra.mxu0 %v406_v36 }
 0x127   : > { %438 = vmatmul.f32.vlgmr.msra.gmra.mxu0 %v405_v37 }
 0x1a4   : > { %v439_v39 = vpop.f32.mrf.mxu0 }
 0x1a5   : > { %v442_v40 = vadd.f32 %v439_v39, %v404_v38 }
 0x1a7   : > { %443 = vst [vmem:[#allocation2] sm:$0xff] %v442_v40 }
 0x1a8 PF: > { %p612_p12 = scmp.ne.s32.totalorder %s956_s22, 1 }
 0x1aa   : > { %447 = sbr.rel (%p612_p12) target bundleno = 436 (0x1b4), region = 64 }
 0x1af   : > { %v448_v41 = vld [vmem:[#allocation2] sm:$0xff] }
 0x1b0   : > { %v741_v42 = vld [vmem:[%s1260_s3] ss:$0 sm:$0xff] }
 0x1b1   : > { %v453_v43 = vadd.f32 %v741_v42, %v448_v41 }
 0x1b3   : > { %454 = vst [vmem:[#allocation9] sm:$0xff] %v453_v43 }
 0x1b4 PF: > { %p639_p4 = scmp.eq.s32.totalorder %s1044_s25, 1  ;;  %s466_s27 = sshll.u32 %s1261_s4, 4  ;;  %s467_s27 = int_to_ptr.hbm [resolvable:$true] %s466_s27 }
 0x1b5   : > { %s971_s11 = smov [#allocation9]  }
 0x1b6   : > { %s464_s10 = sshll.u32 %s971_s11, 4  ;;  %s465_s10 = int_to_ptr.vmem [resolvable:$true] %s464_s10 }
 0x1b7   : > { %625 = dma.vmem_to_hbm [thread:$0]  (%p639_p4), %s465_s10, 128, %s467_s27, [#allocation5]  }
 0x1b8   : > { %921 = dma.done.wait (%p639_p4), [#allocation5], 128  }
 0x1b9   : > { %923 = vsyncadd (%p639_p4), [#allocation5], 4294967168 }
 0x1ba PF: > { %s1283_s22 = sld [smem:[#allocation16_spill]]  ;;  %s1288_s15 = smov %s932_s16 }
 0x1bb   : > { %s1284_s20 = sld [smem:[#allocation14_spill]]  ;;  %s1290_s18 = smov %s944_s19 }
 0x1bc   : > { %s1285_s17 = sld [smem:[#allocation18_spill]]  ;;  %s1242_s19 = smov 0  }
 0x1bd   : > { %s1287_s23 = sld [smem:[#allocation17_spill]] }
 0x1c0   : > { %s21_s24 = sadd.s32 1, %s1283_s22   ;;  %s1286_s22 = sld [smem:[#allocation15_spill]] }
 0x1c1   : > { %p18_p10 = scmp.ge.s32.totalorder %s21_s24, 4   ;;  %s1289_s16 = smov %s1284_s20 }
 0x1c2   : > { %s1291_s20 = smov %s952_s21  ;;  %s1247_s21 = smov 0  }
 0x1c3   :  { %20 = sbr.rel (!%p18_p10) target bundleno = 11 (0xb), region = 117 }
 0x1c8   :  { %480 = vsyncpa [#allocation4], 1 }
 0x1c9   :  { %482 = vsyncpa [#allocation4 + $0x1], 1 }
 0x1ca   :  { %483 = vsyncpa [#allocation7], 1 }
 0x1cb   :  { %485 = vsyncpa [#allocation7 + $0x1], 1 }
 0x1cc   :  { %486 = vsyncpa [#allocation5], 1 }
 0x1cd   :  { %488 = vsyncpa [#allocation5 + $0x1], 1 }

</bundles_post_ra>
